<compile_context>
chip_gen: v7x
topology: tpu7x:2x2x1
jax: 0.10.0
libtpu: 0.0.40
codegen_flags: <defaults>
</compile_context>

<pallas_src>
import jax
import jax.numpy as jnp
from jax.experimental import pallas as pl
from jax.experimental.pallas import tpu as pltpu

IN_F, HID_F, OUT_F = 10, 7, 3

MAX_TILE_B = 16384            # batch rows (lanes) per grid step
SMALL_BATCH_FALLBACK = 1024   # below this, kernel-launch overhead dominates


def _round_up(n, m):
    return ((n + m - 1) // m) * m


def _mlp_kernel(xT_ref, w1_ref, b1_ref, w2_ref, b2_ref, oT_ref):
    # xT: (IN_F, tile_b) ; w1: (HID_F, IN_F) ; b1: (HID_F, 1)
    # w2: (OUT_F, HID_F) ; b2: (OUT_F, 1)    ; oT: (OUT_F, tile_b)
    h = jnp.dot(w1_ref[...], xT_ref[...], preferred_element_type=jnp.float32)
    h = jnp.maximum(h + b1_ref[...], 0.0)          # bias broadcasts over lanes
    out = jnp.dot(w2_ref[...], h, preferred_element_type=jnp.float32)
    oT_ref[...] = (out + b2_ref[...]).astype(oT_ref.dtype)


def _reference_mlp(x, w1, b1, w2, b2):
    # Plain jnp forward (PyTorch layout: y = x @ W.T + b). Used as the
    # small-batch fast path and as the correctness reference in __main__.
    h = jnp.maximum(x @ w1.T + b1, 0.0)
    return h @ w2.T + b2


def localization_net(x, w1, b1, w2, b2, *,
                     max_tile_b=MAX_TILE_B,
                     small_batch_fallback=SMALL_BATCH_FALLBACK):
    """Forward pass of LocalizationNet.

    x : (B, 10) float32
    w1: (7, 10), b1: (7,)   -- fc1 params in PyTorch (out, in) layout
    w2: (3, 7),  b2: (3,)   -- fc2 params
    returns (B, 3)
    """
    B = x.shape[0]
    if B == 0:
        return jnp.zeros((0, OUT_F), x.dtype)
    if B < small_batch_fallback:
        # Launch/DMA fixed cost >> real work at tiny batches.
        return _reference_mlp(x, w1, b1, w2, b2).astype(x.dtype)

    # Balanced batch tiling (tile_b a multiple of 128 lanes).
    n_tiles = pl.cdiv(B, max_tile_b)
    tile_b = _round_up(pl.cdiv(B, n_tiles), 128)
    b_pad = n_tiles * tile_b

    xT = x.T                                   # (IN_F, B), batch -> lane axis
    if b_pad != B:
        xT = jnp.pad(xT, ((0, 0), (0, b_pad - B)))   # zero-padded tail rows

    b1c = b1.reshape(HID_F, 1)
    b2c = b2.reshape(OUT_F, 1)

    param_bytes = 4 * (w1.size + b1.size + w2.size + b2.size)
    cost = pl.CostEstimate(
        flops=2 * b_pad * (IN_F * HID_F + HID_F * OUT_F),
        transcendentals=0,
        bytes_accessed=b_pad * (IN_F + OUT_F) * 4 + param_bytes,
    )

    outT = pl.pallas_call(
        _mlp_kernel,
        out_shape=jax.ShapeDtypeStruct((OUT_F, b_pad), x.dtype),
        grid_spec=pltpu.PrefetchScalarGridSpec(
            num_scalar_prefetch=0,
            grid=(n_tiles,),
            in_specs=[
                # x: tiled over the lane (batch) axis, double-buffered.
                pl.BlockSpec((IN_F, tile_b), lambda i: (0, i)),
                # Weights / biases: constant block index -> copied once.
                pl.BlockSpec((HID_F, IN_F), lambda i: (0, 0)),
                pl.BlockSpec((HID_F, 1), lambda i: (0, 0)),
                pl.BlockSpec((OUT_F, HID_F), lambda i: (0, 0)),
                pl.BlockSpec((OUT_F, 1), lambda i: (0, 0)),
            ],
            out_specs=pl.BlockSpec((OUT_F, tile_b), lambda i: (0, i)),
        ),
        compiler_params=pltpu.CompilerParams(
            dimension_semantics=("parallel",),   # batch tiles are independent
        ),
        cost_estimate=cost,
    )(xT, w1, b1c, w2, b2c)

    return outT.T[:B]                            # back to (B, 3)


def xavier_uniform(key, fan_out, fan_in, dtype=jnp.float32):
    # torch.nn.init.xavier_uniform_ on a PyTorch (out_features, in_features)
    # weight: U(-a, a) with a = sqrt(6 / (fan_in + fan_out)).
    limit = (6.0 / (fan_in + fan_out)) ** 0.5
    return jax.random.uniform(key, (fan_out, fan_in), dtype,
                              minval=-limit, maxval=limit)


def linear_bias(key, fan_in, fan_out, dtype=jnp.float32):
    # PyTorch nn.Linear default bias init: U(-1/sqrt(fan_in), 1/sqrt(fan_in))
    # (init_weights() only re-initializes the weights, not the biases).
    bound = 1.0 / (fan_in ** 0.5)
    return jax.random.uniform(key, (fan_out,), dtype, minval=-bound, maxval=bound)


if __name__ == "__main__":
    key = jax.random.PRNGKey(0)
    k_x1, k_x2, k_w1, k_b1, k_w2, k_b2 = jax.random.split(key, 6)

    w1 = xavier_uniform(k_w1, HID_F, IN_F)    # (7, 10)  PyTorch layout
    b1 = linear_bias(k_b1, IN_F, HID_F)       # (7,)
    w2 = xavier_uniform(k_w2, OUT_F, HID_F)   # (3, 7)
    b2 = linear_bias(k_b2, HID_F, OUT_F)      # (3,)

    def ref_fwd(x):
        return _reference_mlp(x, w1, b1, w2, b2)

    # Case 1: multi-tile grid + ragged tail (force small tiles so grid=(5,)).
    B1 = 4100
    x1 = jax.random.normal(k_x1, (B1, IN_F), jnp.float32)
    out1 = jax.block_until_ready(
        localization_net(x1, w1, b1, w2, b2, max_tile_b=1024))
    assert out1.shape == (B1, OUT_F), out1.shape
    assert jnp.allclose(out1, ref_fwd(x1), atol=1e-5, rtol=1e-5), "mismatch (multi-tile)"

    # Case 2: default (balanced, single-tile) Pallas path.
    out2 = jax.block_until_ready(localization_net(x1, w1, b1, w2, b2))
    assert out2.shape == (B1, OUT_F), out2.shape
    assert jnp.allclose(out2, ref_fwd(x1), atol=1e-5, rtol=1e-5), "mismatch (single-tile)"

    # Case 3: tiny batch -> small-batch fallback path.
    B3 = 8
    x3 = jax.random.normal(k_x2, (B3, IN_F), jnp.float32)
    out3 = jax.block_until_ready(localization_net(x3, w1, b1, w2, b2))
    assert out3.shape == (B3, OUT_F), out3.shape
    assert jnp.allclose(out3, ref_fwd(x3), atol=1e-5, rtol=1e-5), "mismatch (small batch)"

    print("KERNEL_OK")
</pallas_src>

<mosaic_0001>
module attributes {stable_mosaic.version = 11 : i64} {
  func.func @_mlp_kernel(%arg0: i32, %arg1: memref<10x896xf32, #tpu.memory_space<vmem>>, %arg2: memref<7x10xf32, #tpu.memory_space<vmem>>, %arg3: memref<7x1xf32, #tpu.memory_space<vmem>>, %arg4: memref<3x7xf32, #tpu.memory_space<vmem>>, %arg5: memref<3x1xf32, #tpu.memory_space<vmem>>, %arg6: memref<3x896xf32, #tpu.memory_space<vmem>>) attributes {dimension_semantics = [#tpu.dimension_semantics<parallel>], iteration_bounds = array<i64: 5>, scalar_prefetch = 0 : i64, scratch_operands = 0 : i64, tpu.core_type = #tpu.core_type<tc>, window_params = [{transform_indices = @transform_0, window_bounds = array<i64: 10, 896>}, {pipeline_mode = #tpu.pipeline_mode<synchronous>, transform_indices = @transform_1, window_bounds = array<i64: 7, 10>}, {pipeline_mode = #tpu.pipeline_mode<synchronous>, transform_indices = @transform_2, window_bounds = array<i64: 7, 1>}, {pipeline_mode = #tpu.pipeline_mode<synchronous>, transform_indices = @transform_3, window_bounds = array<i64: 3, 7>}, {pipeline_mode = #tpu.pipeline_mode<synchronous>, transform_indices = @transform_4, window_bounds = array<i64: 3, 1>}, {transform_indices = @transform_5, window_bounds = array<i64: 3, 896>}]} {
    %c0 = arith.constant 0 : index
    %c0_0 = arith.constant 0 : index
    %0 = vector.load %arg2[%c0, %c0_0] : memref<7x10xf32, #tpu.memory_space<vmem>>, vector<7x10xf32>
    %c0_1 = arith.constant 0 : index
    %c0_2 = arith.constant 0 : index
    %1 = vector.load %arg1[%c0_1, %c0_2] : memref<10x896xf32, #tpu.memory_space<vmem>>, vector<10x896xf32>
    %cst = arith.constant dense<0.000000e+00> : vector<7x896xf32>
    %2 = tpu.matmul %0, %1, %cst {dimension_numbers = #tpu.dot_dimension_numbers<[1], [0], [0], [1], [0, 0, 1, 1], [], []>} : vector<7x10xf32>, vector<10x896xf32>, vector<7x896xf32> -> vector<7x896xf32>
    %c0_3 = arith.constant 0 : index
    %c0_4 = arith.constant 0 : index
    %3 = vector.load %arg3[%c0_3, %c0_4] : memref<7x1xf32, #tpu.memory_space<vmem>>, vector<7x1xf32>
    %4 = vector.broadcast %3 : vector<7x1xf32> to vector<7x896xf32>
    %5 = arith.addf %2, %4 : vector<7x896xf32>
    %cst_5 = arith.constant 0.000000e+00 : f32
    %6 = vector.broadcast %cst_5 : f32 to vector<7x896xf32>
    %7 = arith.maximumf %5, %6 : vector<7x896xf32>
    %c0_6 = arith.constant 0 : index
    %c0_7 = arith.constant 0 : index
    %8 = vector.load %arg4[%c0_6, %c0_7] : memref<3x7xf32, #tpu.memory_space<vmem>>, vector<3x7xf32>
    %cst_8 = arith.constant dense<0.000000e+00> : vector<3x896xf32>
    %9 = tpu.matmul %8, %7, %cst_8 {dimension_numbers = #tpu.dot_dimension_numbers<[1], [0], [0], [1], [0, 0, 1, 1], [], []>} : vector<3x7xf32>, vector<7x896xf32>, vector<3x896xf32> -> vector<3x896xf32>
    %c0_9 = arith.constant 0 : index
    %c0_10 = arith.constant 0 : index
    %10 = vector.load %arg5[%c0_9, %c0_10] : memref<3x1xf32, #tpu.memory_space<vmem>>, vector<3x1xf32>
    %11 = vector.broadcast %10 : vector<3x1xf32> to vector<3x896xf32>
    %12 = arith.addf %9, %11 : vector<3x896xf32>
    %c0_11 = arith.constant 0 : index
    %c0_12 = arith.constant 0 : index
    %13 = vector.load %arg6[%c0_11, %c0_12] : memref<3x896xf32, #tpu.memory_space<vmem>>, vector<3x896xf32>
    tpu.vector_store %arg6[%c0_11, %c0_12], %12 {strides = array<i32>} : memref<3x896xf32, #tpu.memory_space<vmem>>, vector<3x896xf32>,
    return
  }
  func.func @transform_0(%arg0: i32) -> (i32, i32) {
    %c0_i32 = arith.constant 0 : i32
    %c0_i32_0 = arith.constant 0 : i32
    return %c0_i32, %arg0 : i32, i32
  }
  func.func @transform_1(%arg0: i32) -> (i32, i32) {
    %c0_i32 = arith.constant 0 : i32
    %c0_i32_0 = arith.constant 0 : i32
    %c0_i32_1 = arith.constant 0 : i32
    return %c0_i32, %c0_i32_0 : i32, i32
  }
  func.func @transform_2(%arg0: i32) -> (i32, i32) {
    %c0_i32 = arith.constant 0 : i32
    %c0_i32_0 = arith.constant 0 : i32
    %c0_i32_1 = arith.constant 0 : i32
    return %c0_i32, %c0_i32_0 : i32, i32
  }
  func.func @transform_3(%arg0: i32) -> (i32, i32) {
    %c0_i32 = arith.constant 0 : i32
    %c0_i32_0 = arith.constant 0 : i32
    %c0_i32_1 = arith.constant 0 : i32
    return %c0_i32, %c0_i32_0 : i32, i32
  }
  func.func @transform_4(%arg0: i32) -> (i32, i32) {
    %c0_i32 = arith.constant 0 : i32
    %c0_i32_0 = arith.constant 0 : i32
    %c0_i32_1 = arith.constant 0 : i32
    return %c0_i32, %c0_i32_0 : i32, i32
  }
  func.func @transform_5(%arg0: i32) -> (i32, i32) {
    %c0_i32 = arith.constant 0 : i32
    %c0_i32_0 = arith.constant 0 : i32
    return %c0_i32, %arg0 : i32, i32
  }
}

</mosaic_0001>

<bundles_post_ra>
// kernel: tpu_custom_call.1
= control target key start
LH: loop header
LB: loop body
LE: loop exit
PB: predicated region body
PF: predicated region fallthrough
CT: control target
= control target key end

     0   :  { %10 = vsyncpa [#allocation3], 0  ;;  %s1493_s0 = inlined_call_operand.hbm [shape: f32[10,4480], index: 0, kind: input, shape index: {}]   ;;  %s1494_s1 = inlined_call_operand.vmem [shape: f32[7,10], index: 1, kind: input, shape index: {}]   ;;  %s1495_s2 = inlined_call_operand.vmem [shape: f32[7,1], index: 2, kind: input, shape index: {}]   ;;  %s1496_s3 = inlined_call_operand.vmem [shape: f32[3,7], index: 3, kind: input, shape index: {}]   ;;  %s1497_s4 = inlined_call_operand.vmem [shape: f32[3,1], index: 4, kind: input, shape index: {}]   ;;  %s1498_s5 = inlined_call_operand.hbm [shape: f32[3,4480], index: 5, kind: output, shape index: {}]  }
   0x1   :  { %12 = vsyncpa [#allocation3 + $0x1], 0 }
   0x2   :  { %13 = vsyncpa [#allocation4], 0 }
   0x3   :  { %15 = vsyncpa [#allocation4 + $0x1], 0  ;;  %s1266_s18 = smov 0   ;;  %s1268_s19 = smov 0  }
   0x4   :  { %s1270_s20 = smov 0   ;;  %s1272_s21 = smov 0  }
   0x5 LB: > { %s1287_s22 = sadd.s32 4294967295, %s1224_s21   ;;  %s999_s23 = sadd.s32 4294967294, %s1224_s21   ;;  %s1224_s21 = sphi %s1272_s21, %s1512_s21   ;;  %s1220_s20 = sphi %s1270_s20, %s1511_s20   ;;  %s1216_s19 = sphi %s1268_s19, %s1510_s19   ;;  %s1212_s18 = sphi %s1266_s18, %s1509_s18  }
   0x6   : > { %s1291_s24 = sadd.s32 1, %s1224_s21   ;;  %s28_s25 = sadd.s32 1, %s1220_s20 }
   0x7   : > { %s25_s26 = ssub.s32 %s1224_s21, %s1291_s24  ;;  %p35_p0 = scmp.ne.s32.totalorder %s1220_s20, %s1216_s19 }
   0x8   : > { %p26_p1 = scmp.eq.s32.totalorder %s25_s26, 0  ;;  %p36_p2 = scmp.eq.s32.totalorder %s1224_s21, 0 }
   0x9   : > { %p41_p3 = scmp.ne.s32.totalorder %s1216_s19, %s1212_s18  ;;  %p42_p4 = scmp.eq.s32.totalorder %s1287_s22, 0 }
   0xa   : > { %s1303_s27 = scalar_select %p26_p1, %s1220_s20, %s28_s25  }
   0xb   : > { %p37_p5 = por %p36_p2, %p35_p0  ;;  %p1305_p6 = por %p42_p4, %p41_p3 }
   0xc   : > { %p149_p7 = scmp.eq.s32.totalorder %s1287_s22, 4  ;;  %p155_p8 = scmp.eq.s32.totalorder %s999_s23, 4 }
   0xd   : > { %p1085_p9 = scmp.lt.s32.totalorder %s1224_s21, 5  ;;  %s187_s6 = sand.u32 1, %s1220_s20  }
   0xe   : > { %p1311_p10 = por %p149_p7, %p35_p0  ;;  %p1315_p11 = por %p155_p8, %p41_p3 }
   0xf   : > { %s1029_s7 = smul.u32 896, %s1224_s21  ;;  %p1326_p12 = pnand %p1085_p9, %p37_p5 }
  0x10   : > { %s1501_s29 = scalar_select %p1311_p10, 1, 0 }
  0x11   : > { %s1502_s30 = scalar_select %p1315_p11, 1, 0 }
  0x12   : > { %s1070_s8 = smul.u32 112, %s187_s6  ;;  %s1324_s11 = scalar_lea.hbm %s1493_s0, %s1029_s7 }
  0x13   : > { %s1333_s15 = scalar_lea.sflag [#allocation3], %s187_s6  ;;  %s1128_s16 = scalar_lea.hbm %s1324_s11, 1792 }
  0x14   : > { %s191_s13 = scalar_lea.vmem [#allocation2], %s1070_s8  ;;  %p1129_p0 = scmp.ne.s32.totalorder %s1324_s11, %s1128_s16 }
  0x15   : > { %s198_s14 = sshll.u32 %s191_s13, 4  ;;  %p1130_p1 = pneg %p1326_p12  ;;  %s1330_s14 = int_to_ptr.vmem [resolvable:$true] %s198_s14 }
  0x16   : > { %s1133_s25 = scalar_lea.hbm %s1493_s0, 8960  ;;  %p1134_p4 = scmp.lt.u32.totalorder %s1324_s11, %s1493_s0 }
  0x17   : > { %p1131_p2 = pnand %p1130_p1, %p1129_p0  ;;  %p1135_p5 = scmp.lt.u32.totalorder %s1133_s25, %s1128_s16 }
  0x18   : > { %p1137_p8 = scmp.lt.u32.totalorder %s1128_s16, %s1324_s11 }
  0x19   : > { %p1132_p3 = pneg %p1131_p2  ;;  %p1136_p7 = por %p1135_p5, %p1134_p4 }
  0x1b   : > { %p1138_p9 = por %p1137_p8, %p1136_p7 }
  0x1d   : > { %p1139_p13 = pnand %p1138_p9, %p1132_p3 }
  0x1f   : > { %1142 = shalt.err (!%p1139_p13)
}
  0x20   : > { %s1143_s6 = scalar_lea.vmem %s1330_s14, 1792  ;;  %s1226_s8 = smov [#allocation2]  }
  0x21   : > { %p1144_p0 = scmp.ne.s32.totalorder %s1330_s14, %s1143_s6  ;;  %s1148_s9 = sshll.u32 %s1226_s8, 4  ;;  %s1149_s9 = int_to_ptr.vmem [resolvable:$false] %s1148_s9 }
  0x22   : > { %s1150_s10 = scalar_lea.vmem %s1149_s9, 3584  ;;  %p1151_p10 = scmp.lt.s32.totalorder %s1330_s14, %s1149_s9 }
  0x23   : > { %p1146_p2 = pnand %p1144_p0, %p1130_p1  ;;  %p1152_p4 = scmp.lt.s32.totalorder %s1150_s10, %s1143_s6 }
  0x25   : > { %p1147_p11 = pneg %p1146_p2  ;;  %p1153_p5 = por %p1152_p4, %p1151_p10 }
  0x27   : > { %p1154_p7 = pnand %p1153_p5, %p1147_p11 }
  0x29   : > { %1157 = shalt.err (!%p1154_p7)
}
  0x2a   : > { %s1227_s13 = smov 4480   ;;  %s1228_s16 = smov 896  }
  0x2b   : > { %s1229_s17 = smov 56   ;;  %p206_p13 = scmp.lt.s32.totalorder %s1224_s21, 6 }
  0x2c   : > { %1080 = dma.hbm_to_vmem [thread:$0]  (!%p1326_p12), %s1324_s11, 1792, %s1330_s14, %s1333_s15, %s1227_s13, %s1228_s16, %s1229_s17  }
  0x2d   : > { %p1504_p1 = scmp.ge.s32.totalorder %s1224_s21, 1 }
  0x2f   : > { %p207_p3 = pnand %p1504_p1, %p206_p13 }
  0x30   : > { %s1365_s23 = sand.u32 (!%p207_p3), 1, %s1216_s19  }
  0x31   : > { %210 = sbr.rel (%p207_p3) target bundleno = 519 (0x207), region = 40  ;;  %s213_s26 = scalar_lea.sflag (!%p207_p3), [#allocation3], %s1365_s23 }
  0x32   : > { %s1071_s25 = smul.u32 (!%p207_p3), 112, %s1365_s23 }
  0x34   : > { %s1369_s7 = scalar_lea.vmem (!%p207_p3), [#allocation2], %s1071_s25 }
  0x38   : > { %1203 = dma.done.wait (%p1305_p6), %s213_s26, 1792  }
  0x39   : > { %1205 = vsyncadd (%p1305_p6), %s213_s26, 4294965504  ;;  %v1230_v0 = vmov 0.0   ;;  %v1231_v1 = vmov 0   ;;  %vm270_vm0 = vcmask 1041408   ;;  %vm1232_vm1 = vmmov 1   ;;  %v247_v3 = vld [vmem:[%s1369_s7 + $0x8] sm:$0xff] }
  0x3a   : > { %356 = vmatprep.mubr.f32.mxu0 %v1230_v0  ;;  %427 = vmatprep.mubr.f32.mxu1 %v1230_v0  ;;  %vm1377_vm2 = vmpackc.low %vm270_vm0, %vm1232_vm1  ;;  %v254_v4 = vld [vmem:[%s1369_s7 + $0x40] sm:$0x3]  ;;  %v249_v5 = vld [vmem:[%s1369_s7 + $0x18] sm:$0xff]  ;;  %vm266_vm3 = vcmask 80896   ;;  %v1233_v26 = vmov 0.0|0.0   ;;  %vm1234_vm4 = vmmov 0  }
  0x3b   : > { %1127 = vset.pattern.permute.xlu0 %v1231_v1  ;;  %v1048_v6 = vpack.c.bf16 %v254_v4, %v247_v3  ;;  %v256_v7 = vld [vmem:[%s1369_s7 + $0x50] sm:$0x3]  ;;  %v246_v8 = vld [vmem:[%s1369_s7] sm:$0xff]  ;;  %v253_v9 = vld [vmem:[%s1369_s7 + $0x38] sm:$0x3]  ;;  %vm593_vm5 = vcmask 1046528  }
  0x3c   : > { %v1054_v10 = vpack.c.bf16 %v256_v7, %v249_v5  ;;  %v1051_v11 = vpack.c.bf16 %v253_v9, %v246_v8  ;;  %v248_v12 = vld [vmem:[%s1369_s7 + $0x10] sm:$0xff]  ;;  %v255_v13 = vld [vmem:[%s1369_s7 + $0x48] sm:$0x3]  ;;  %v258_v17 = vld [vmem:[%s1369_s7 + $0x60] sm:$0x3]  ;;  %vm589_vm6 = vcmask 56320  }
  0x3d   : > { %v245_v14 = vld [vmem:[%s1494_s1] sm:$0x7f]  ;;  %1050 = vmatprep.subr.msk.bf16.mxu0 %vm1377_vm2, %v1048_v6  ;;  %v1057_v15 = vpack.c.bf16 %v255_v13, %v248_v12  ;;  %v251_v16 = vld [vmem:[%s1369_s7 + $0x28] sm:$0xff]  ;;  %v257_v20 = vld [vmem:[%s1369_s7 + $0x58] sm:$0x3]  ;;  %s1072_s10 = smul.u32 28, %s1365_s23 }
  0x3e   : > { %v250_v18 = vld [vmem:[%s1369_s7 + $0x20] sm:$0xff]  ;;  %1056 = vmatprep.subr.msk.bf16.mxu1 %vm1377_vm2, %v1054_v10  ;;  %1053 = vmatpush1.bf16.msk.msra.mxu0 %vm1377_vm2, %v1051_v11  ;;  %v1060_v19 = vpack.c.bf16 %v258_v17, %v251_v16  ;;  %v252_v21 = vld [vmem:[%s1369_s7 + $0x30] sm:$0xff]  ;;  %v259_v22 = vld [vmem:[%s1369_s7 + $0x68] sm:$0x3]  ;;  %s1030_s13 = smul.u32 448, %s1287_s22  ;;  %s915_s22 = scalar_lea.sflag [#allocation4], %s1365_s23 }
  0x3f   : > { %1059 = vmatpush1.bf16.msk.msra.mxu1 %vm1377_vm2, %v1057_v15  ;;  %v1063_v23 = vpack.c.bf16 %v257_v20, %v250_v18  ;;  %v1067_v24 = vpack.c.bf16 %v259_v22, %v252_v21  ;;  %v260_v25 = vld [vmem:[%s1495_s2] sm:$0x7f]  ;;  %s242_s16 = scalar_lea.vmem [#allocation5], %s1072_s10  ;;  %p1507_p10 = scmp.ne.s32.totalorder %s1501_s29, 0 }
  0x40   : > { %1062 = vmatprep.subr.msk.bf16.mxu0 %vm1377_vm2, %v1060_v19  ;;  %1066 = vmatprep.subr.bf16.mxu1 %v1233_v26  ;;  %v583_v27 = vld [vmem:[%s1497_s4] sm:$0x7]  ;;  %s929_s17 = sshll.u32 %s242_s16, 4  ;;  %s1450_s7 = scalar_lea.hbm %s1498_s5, %s1030_s13  ;;  %s1452_s17 = int_to_ptr.vmem [resolvable:$true] %s929_s17 }
  0x41   : > { %1006 = vmatmul.mubr.msk.f32.vlgmr.msra.gmra.mrb[0].mxu0 %vm266_vm3, %v245_v14  ;;  %263 = vperm.xlu0 %1127, %v260_v25   ;;  %v582_v40 = vld [vmem:[%s1496_s3] sm:$0x7]  ;;  %s1158_s28 = scalar_lea.vmem %s1452_s17, 448  ;;  %s1235_s11 = smov [#allocation5]  }
  0x42   : > { %1009 = vmatmul.mubr.msk.f32.vlgmr.msra.gmra.mrb[0].mxu1 %vm266_vm3, %v245_v14  ;;  %1065 = vmatpush1.bf16.msk.msra.mxu0 %vm1377_vm2, %v1063_v23  ;;  %p1159_p6 = scmp.ne.s32.totalorder %s1452_s17, %s1158_s28  ;;  %s1162_s12 = sshll.u32 %s1235_s11, 4  ;;  %s1163_s12 = int_to_ptr.vmem [resolvable:$false] %s1162_s12 }
  0x43   : > { %1069 = vmatpush3.bf16.msk.msra.mxu1 %vm1377_vm2, %v1067_v24  ;;  %498 = vmatprep.mubr.f32.mxu0 %v1230_v0  ;;  %s1164_s14 = scalar_lea.vmem %s1163_s12, 896  ;;  %p1165_p8 = scmp.lt.s32.totalorder %s1452_s17, %s1163_s12 }
  0x44   : > { %1040 = vmatprep.mubr.msk.f32.mxu1 %vm1234_vm4, %v1230_v0  ;;  %p1160_p11 = pnand %p1159_p6, %p1507_p10  ;;  %p1166_p9 = scmp.lt.s32.totalorder %s1164_s14, %s1158_s28 }
  0x45   : > { %1012 = vmatmul.mubr.msk.f32.vlgmr.msra.gmra.mrb[2].mxu0 %vm266_vm3, %v245_v14  ;;  %586 = vperm.xlu0 %1127, %v583_v27  }
  0x46   : > { %1041 = vmatmul.mubr.msk.f32.vlgmr.msra.gmra.mrb[2].mxu1 %vm266_vm3, %v245_v14  ;;  %679 = vmatprep.mubr.f32.mxu0 %v1230_v0  ;;  %p1161_p12 = pneg %p1160_p11  ;;  %p1167_p0 = por %p1166_p9, %p1165_p8 }
  0x47   : > { %750 = vmatprep.mubr.f32.mxu1 %v1230_v0 }
  0x48   : > { %p1168_p2 = pnand %p1167_p0, %p1161_p12 }
  0xc0   : > { %v264_v28 = vpop.permute.xlu0 %263 }
  0xc4   : > { %v587_v52 = vpop.permute.xlu0 %586 }
 0x114   : > { %v358_v29 = vpop.f32.mrb[0].mxu0 }
 0x115   : > { %v359_v30 = vadd.f32 %v358_v29, %v264_v28  ;;  %v429_v31 = vpop.f32.mrb[0].mxu1  ;;  %v360_v32 = vpop.f32.mrb[1].mxu0 }
 0x116   : > { %v430_v33 = vadd.f32 %v429_v31, %v264_v28  ;;  %v361_v34 = vadd.f32 %v360_v32, %v264_v28  ;;  %v431_v35 = vpop.f32.mrb[1].mxu1 }
 0x117   : > { %v432_v36 = vadd.f32 %v431_v35, %v264_v28  ;;  %v575_v41 = vmax.f32 %v359_v30, 0.0 }
 0x118   : > { %v577_v37 = vmax.f32 %v430_v33, 0.0  ;;  %v576_v38 = vmax.f32 %v361_v34, 0.0  ;;  %v500_v39 = vpop.f32.mrb[2].mxu0 }
 0x119   : > { %v578_v42 = vmax.f32 %v432_v36, 0.0  ;;  %v501_v43 = vadd.f32 %v500_v39, %v264_v28  ;;  %v571_v44 = vpop.f32.mrb[2].mxu1  ;;  %v502_v45 = vpop.f32.mrb[3].mxu0 }
 0x11a   : > { %v572_v46 = vadd.f32 %v571_v44, %v264_v28  ;;  %v503_v47 = vadd.f32 %v502_v45, %v264_v28  ;;  %1015 = vmatprep.subr.msk.mxu0 %vm593_vm5, %v576_v38  ;;  %v1042_v48 = vpop.f32.mrb[3].mxu1 }
 0x11b   : > { %1018 = vmatprep.subr.msk.mxu1 %vm593_vm5, %v578_v42  ;;  %1016 = vmatpush1.msk.msra.mxu0 %vm593_vm5, %v575_v41  ;;  %v579_v51 = vmax.f32 %v501_v43, 0.0 }
 0x11c   : > { %v581_v49 = vmax.f32 %v572_v46, 0.0  ;;  %v580_v50 = vmax.f32 %v503_v47, 0.0  ;;  %1019 = vmatpush1.msk.msra.mxu1 %vm593_vm5, %v577_v37  ;;  %1017 = vmatmul.mubr.msk.f32.vlgmr.msra.gmra.mrb[4].mxu0 %vm589_vm6, %v582_v40 }
 0x11d   : > { %1020 = vmatmul.mubr.msk.f32.vlgmr.msra.gmra.mrb[4].mxu1 %vm589_vm6, %v582_v40  ;;  %1043 = vmatprep.subr.mxu1 %v1230_v0 }
 0x11e   : > { %1044 = vmatpush3.msk.msra.mxu1 %vm593_vm5, %v581_v49  ;;  %1021 = vmatprep.subr.msk.mxu0 %vm593_vm5, %v580_v50 }
 0x11f   : > { %1022 = vmatpush1.msk.msra.mxu0 %vm593_vm5, %v579_v51  ;;  %821 = vmatprep.mubr.f32.mxu0 %v1230_v0 }
 0x120   : > { %1045 = vmatprep.mubr.msk.f32.mxu1 %vm1234_vm4, %v1230_v0  ;;  %1023 = vmatmul.mubr.msk.f32.vlgmr.msra.gmra.mrb[6].mxu0 %vm589_vm6, %v582_v40 }
 0x121   : > { %1046 = vmatmul.mubr.msk.f32.vlgmr.msra.gmra.mrb[6].mxu1 %vm589_vm6, %v582_v40 }
 0x1ef   : > { %v681_v53 = vpop.f32.mrb[4].mxu0 }
 0x1f0   : > { %v682_v54 = vadd.f32 %v681_v53, %v587_v52  ;;  %v752_v55 = vpop.f32.mrb[4].mxu1  ;;  %v683_v56 = vpop.f32.mrb[5].mxu0 }
 0x1f1   : > { %v753_v57 = vadd.f32 %v752_v55, %v587_v52  ;;  %v684_v58 = vadd.f32 %v683_v56, %v587_v52  ;;  %v754_v59 = vpop.f32.mrb[5].mxu1 }
 0x1f2   : > { %v755_v60 = vadd.f32 %v754_v59, %v587_v52 }
 0x1f3   : > { %v904_v61 = vcombine.low %v682_v54, %v684_v58  ;;  %v823_v62 = vpop.f32.mrb[6].mxu0 }
 0x1f4   : > { %v905_v63 = vcombine.low %v753_v57, %v755_v60  ;;  %v824_v0 = vadd.f32 %v823_v62, %v587_v52  ;;  %v894_v1 = vpop.f32.mrb[6].mxu1  ;;  %v825_v2 = vpop.f32.mrb[7].mxu0 }
 0x1f5   : > { %910 = vst [vmem:[%s242_s16] sm:$0x77] %v904_v61  ;;  %v895_v3 = vadd.f32 %v894_v1, %v587_v52  ;;  %v826_v4 = vadd.f32 %v825_v2, %v587_v52  ;;  %v1047_v5 = vpop.f32.mrb[7].mxu1 }
 0x1f6   : > { %911 = vst [vmem:[%s242_s16 + $0x8] sm:$0x77] %v905_v63 }
 0x1f7   : > { %913 = vst [vmem:[%s242_s16 + $0x18] sm:$0x7] %v895_v3  ;;  %v906_v6 = vcombine.low %v824_v0, %v826_v4 }
 0x1f9   : > { %912 = vst [vmem:[%s242_s16 + $0x10] sm:$0x77] %v906_v6 }
 0x1fa   : > { %1171 = shalt.err (!%p1168_p2)
}
 0x1fb   : > { %s1172_s23 = scalar_lea.hbm %s1450_s7, 448  ;;  %s1176_s8 = scalar_lea.hbm %s1498_s5, 2240 }
 0x1fc   : > { %p1173_p4 = scmp.ne.s32.totalorder %s1450_s7, %s1172_s23  ;;  %p1177_p13 = scmp.lt.u32.totalorder %s1450_s7, %s1498_s5 }
 0x1fd   : > { %p1178_p1 = scmp.lt.u32.totalorder %s1176_s8, %s1172_s23  ;;  %p1180_p6 = scmp.lt.u32.totalorder %s1172_s23, %s1450_s7 }
 0x1fe   : > { %p1174_p5 = pnand %p1173_p4, %p1507_p10 }
 0x1ff   : > { %p1179_p3 = por %p1178_p1, %p1177_p13 }
 0x200   : > { %p1175_p7 = pneg %p1174_p5 }
 0x201   : > { %p1181_p11 = por %p1180_p6, %p1179_p3 }
 0x203   : > { %p1182_p12 = pnand %p1181_p11, %p1175_p7 }
 0x205   : > { %1185 = shalt.err (!%p1182_p12)
}
 0x206   : > { %1075 = dma.vmem_to_hbm [thread:$0]  (%p1507_p10), %s1452_s17, 448, %s1450_s7, %s915_s22  }
 0x207 PF: > { %p1086_p8 = scmp.ge.s32.totalorder %s1224_s21, 2  ;;  %s941_s13 = sand.u32 1, %s1212_s18  }
 0x208   : > { %p1508_p9 = scmp.ne.s32.totalorder %s1502_s30, 0  ;;  %s942_s16 = scalar_lea.sflag [#allocation4], %s941_s13 }
 0x20a   : > { %p1082_p0 = pnand %p1086_p8, %p1508_p9 }
 0x20c   : > { %1207 = dma.done.wait (!%p1082_p0), %s942_s16, 448  }
 0x20d   : > { %1209 = vsyncadd (!%p1082_p0), %s942_s16, 4294966848  ;;  %p18_p2 = scmp.ge.s32.totalorder %s1291_s24, 7   ;;  %s1509_s18 = smov %s1216_s19 }
 0x20e   : > { %s1510_s19 = smov %s1220_s20  ;;  %s1511_s20 = smov %s1303_s27 }
 0x20f   : > { %s1512_s21 = smov %s1291_s24  ;;  %20 = sbr.rel (!%p18_p2) target bundleno = 5 (0x5), region = 85 }
 0x216   :  { %947 = vsyncpa [#allocation3], 1 }
 0x217   :  { %949 = vsyncpa [#allocation3 + $0x1], 1 }
 0x218   :  { %950 = vsyncpa [#allocation4], 1 }
 0x219   :  { %952 = vsyncpa [#allocation4 + $0x1], 1 }

</bundles_post_ra>
